<compile_context>
chip_gen: v7x
topology: tpu7x:2x2x1
jax: 0.10.0
libtpu: 0.0.40
codegen_flags: <defaults>
</compile_context>

<pallas_src>
import math
from functools import partial

import jax
import jax.numpy as jnp
from jax.experimental import pallas as pl
from jax.experimental.pallas import tpu as pltpu

_INV_SQRT2 = 0.7071067811865476  # 1/sqrt(2) for exact erf-GELU


def _gelu(h, approximate):
    if approximate:
        # tanh-approx GELU: transcendental executes in the EUP slot (nearly
        # free next to the MXU). Small documented deviation from exact erf.
        return jax.nn.gelu(h, approximate=True)
    return 0.5 * h * (1.0 + jax.lax.erf(h * _INV_SQRT2))


# --------------------------------------------------------------------------
# kernels
# --------------------------------------------------------------------------

def _mlp_resident_kernel(x_ref, w1_ref, b1_ref, w2_ref, b2_ref, o_ref,
                         *, approximate_gelu, precision):
    # Weights-resident single pass: W1/W2/biases have constant block indices,
    # so Pallas DMAs them once and re-uses them for every M tile.
    h = jnp.dot(x_ref[...], w1_ref[...],
                preferred_element_type=jnp.float32, precision=precision)
    h = _gelu(h + b1_ref[...], approximate_gelu)
    out = jnp.dot(h.astype(w2_ref.dtype), w2_ref[...],
                  preferred_element_type=jnp.float32, precision=precision)
    o_ref[...] = (out + b2_ref[...]).astype(o_ref.dtype)


def _mlp_ktiled_kernel_f32out(x_ref, w1_ref, b1_ref, w2_ref, b2_ref, o_ref,
                              *, approximate_gelu, precision):
    # f32 output: the output block index is constant across k, so it stays
    # resident in VMEM -> accumulate into it directly (no scratch).
    k = pl.program_id(1)

    @pl.when(k == 0)
    def _():
        o_ref[...] = jnp.zeros_like(o_ref)

    h = jnp.dot(x_ref[...], w1_ref[...],
                preferred_element_type=jnp.float32, precision=precision)
    h = _gelu(h + b1_ref[...], approximate_gelu)
    o_ref[...] += jnp.dot(h.astype(w2_ref.dtype), w2_ref[...],
                          preferred_element_type=jnp.float32,
                          precision=precision)

    @pl.when(k == pl.num_programs(1) - 1)
    def _():
        o_ref[...] = o_ref[...] + b2_ref[...]


def _mlp_ktiled_kernel_acc(x_ref, w1_ref, b1_ref, w2_ref, b2_ref, o_ref,
                           acc_ref, *, approximate_gelu, precision):
    # Non-f32 output: accumulate in an f32 VMEM scratch, cast at the end.
    k = pl.program_id(1)

    @pl.when(k == 0)
    def _():
        acc_ref[...] = jnp.zeros_like(acc_ref)

    h = jnp.dot(x_ref[...], w1_ref[...],
                preferred_element_type=jnp.float32, precision=precision)
    h = _gelu(h + b1_ref[...], approximate_gelu)
    acc_ref[...] += jnp.dot(h.astype(w2_ref.dtype), w2_ref[...],
                            preferred_element_type=jnp.float32,
                            precision=precision)

    @pl.when(k == pl.num_programs(1) - 1)
    def _():
        o_ref[...] = (acc_ref[...] + b2_ref[...]).astype(o_ref.dtype)


# --------------------------------------------------------------------------
# tiling / VMEM accounting
# --------------------------------------------------------------------------

def _round_up(x, m):
    return ((x + m - 1) // m) * m


def _vmem_caps():
    """Generation-aware VMEM budget (tiling) and scoped-VMEM request cap."""
    try:
        cap = int(pltpu.get_tpu_info().vmem_capacity_bytes)
    except Exception:
        cap = 64 * 1024 * 1024  # conservative: assume v7x-sized (64 MiB/TC)
    if cap <= 64 * 1024 * 1024:
        # v7x-like: 64 MiB per TensorCore.  Modest tiles, leave headroom,
        # never request ~75% of physical VMEM.
        return dict(budget=26 * 1024 * 1024, limit_cap=40 * 1024 * 1024,
                    tm_max=512, small_vmem=True)
    # v5e / v6e: 128 MiB.  Large tiles flip the k-tiled path to MXU-bound.
    return dict(budget=64 * 1024 * 1024, limit_cap=100 * 1024 * 1024,
                tm_max=1024, small_vmem=False)


def _est_resident(tm, din_p, h_p, dout_p, bpe, out_bpe):
    weights = 2 * (din_p * h_p + h_p * dout_p) * bpe   # conservative x2 buffers
    biases = 2 * (h_p + dout_p) * 4
    x_blk = 2 * tm * din_p * bpe
    o_blk = 2 * tm * dout_p * out_bpe
    h_tmp = tm * h_p * (4 + bpe)                        # f32 h + cast copy
    return weights + biases + x_blk + o_blk + h_tmp


def _est_ktiled(tm, th, din_p, dout_p, bpe, out_bpe, use_scratch):
    x_blk = 2 * tm * din_p * bpe
    w_blk = 2 * (din_p * th + th * dout_p) * bpe
    b_blk = 2 * (th + dout_p) * 4
    o_blk = tm * dout_p * out_bpe          # block index constant across k
    scratch = tm * dout_p * 4 if use_scratch else 0
    h_tmp = tm * th * (4 + bpe)
    return x_blk + w_blk + b_blk + o_blk + scratch + h_tmp


def _pick_resident(M, din_p, h_p, dout_p, bpe, out_bpe, budget, tm_max):
    tm = min(tm_max, _round_up(M, 8))
    while _est_resident(tm, din_p, h_p, dout_p, bpe, out_bpe) > budget and tm > 8:
        tm = _round_up(max(8, tm // 2), 8)
    est = _est_resident(tm, din_p, h_p, dout_p, bpe, out_bpe)
    if est <= budget:
        return tm, est
    return None, est


def _pick_ktiled(M, din_p, h_p, dout_p, bpe, out_bpe, budget, tm_max,
                 use_scratch):
    # Prefer tile_h a multiple of 256 (v6e/v7x MXUs are 2x256x256); shrink
    # tile_m first and only fall back to tile_h=128 as a last resort.
    th_opts = [t for t in (2048, 1024, 512, 256) if t <= h_p and h_p % t == 0]
    if 128 not in th_opts:
        th_opts.append(128 if h_p % 128 == 0 else h_p)
    tm = min(tm_max, _round_up(M, 8))
    ti = 0
    while _est_ktiled(tm, th_opts[ti], din_p, dout_p, bpe, out_bpe,
                      use_scratch) > budget:
        if tm > 256:
            tm = _round_up(max(8, tm // 2), 8)
        elif ti + 1 < len(th_opts):
            ti += 1
        elif tm > 8:
            tm = _round_up(max(8, tm // 2), 8)
        else:
            break
    th = th_opts[ti]
    est = _est_ktiled(tm, th, din_p, dout_p, bpe, out_bpe, use_scratch)
    return tm, th, est


def _ensure_two_tiles(tm, M):
    # The "parallel" M axis is what shards across v7x's two TensorCores; make
    # sure there are at least 2 blocks when possible.
    if _round_up(M, tm) // tm < 2 and tm >= 16:
        tm = _round_up(tm // 2, 8)
    return tm


# --------------------------------------------------------------------------
# wrapper
# --------------------------------------------------------------------------

def mlp_pallas(x, w1, b1, w2, b2, *, compute_dtype=jnp.bfloat16,
               approximate_gelu=False, force_ktiled=False):
    """Pallas TPU forward of Mlp: fc2(GELU(fc1(x))); dropout p=0 is identity.

    x: (B, N, Din); w1: (Din, H); b1: (H,); w2: (H, Dout); b2: (Dout,).
    compute_dtype: MXU operand dtype (bf16 default = fast path; pass
    jnp.float32 for tight parity with the PyTorch f32 forward — it then uses
    Precision.HIGHEST on the MXU).  Accumulation is always f32.
    """
    B, N, Din = x.shape
    H = w1.shape[1]
    Dout = w2.shape[1]
    M = B * N
    out_dtype = x.dtype

    # Lane dims padded to multiples of 128 (lane-dense stores, (8,128) rule).
    Din_p = _round_up(Din, 128)
    H_p = _round_up(H, 128)
    Dout_p = _round_up(Dout, 128)

    bpe = jnp.dtype(compute_dtype).itemsize
    out_bpe = jnp.dtype(out_dtype).itemsize
    caps = _vmem_caps()
    budget, limit_cap = caps["budget"], caps["limit_cap"]
    tm_max, small_vmem = caps["tm_max"], caps["small_vmem"]

    f32_compute = jnp.dtype(compute_dtype) == jnp.dtype(jnp.float32)
    precision = jax.lax.Precision.HIGHEST if f32_compute else None

    tm_res, _ = (None, None) if force_ktiled else _pick_resident(
        M, Din_p, H_p, Dout_p, bpe, out_bpe, budget, tm_max)
    use_resident = tm_res is not None

    def _pad_inputs(M_p):
        x2 = jnp.pad(x.reshape(M, Din),
                     ((0, M_p - M), (0, Din_p - Din))).astype(compute_dtype)
        w1p = jnp.pad(w1, ((0, Din_p - Din), (0, H_p - H))).astype(compute_dtype)
        w2p = jnp.pad(w2, ((0, H_p - H), (0, Dout_p - Dout))).astype(compute_dtype)
        b1p = jnp.pad(b1, (0, H_p - H)).reshape(1, H_p).astype(jnp.float32)
        b2p = jnp.pad(b2, (0, Dout_p - Dout)).reshape(1, Dout_p).astype(jnp.float32)
        return x2, w1p, b1p, w2p, b2p

    if use_resident:
        tile_m = _ensure_two_tiles(tm_res, M)
        M_p = _round_up(M, tile_m)
        est = _est_resident(tile_m, Din_p, H_p, Dout_p, bpe, out_bpe)
        vmem_limit = int(min(limit_cap,
                             max(est + 8 * 1024 * 1024, 16 * 1024 * 1024)))
        x2, w1p, b1p, w2p, b2p = _pad_inputs(M_p)

        kernel = partial(_mlp_resident_kernel,
                         approximate_gelu=approximate_gelu, precision=precision)
        out = pl.pallas_call(
            kernel,
            out_shape=jax.ShapeDtypeStruct((M_p, Dout_p), out_dtype),
            grid_spec=pltpu.PrefetchScalarGridSpec(
                num_scalar_prefetch=0,
                grid=(M_p // tile_m,),
                in_specs=[
                    pl.BlockSpec((tile_m, Din_p), lambda i: (i, 0)),
                    pl.BlockSpec((Din_p, H_p), lambda i: (0, 0)),   # resident
                    pl.BlockSpec((1, H_p), lambda i: (0, 0)),       # resident
                    pl.BlockSpec((H_p, Dout_p), lambda i: (0, 0)),  # resident
                    pl.BlockSpec((1, Dout_p), lambda i: (0, 0)),    # resident
                ],
                out_specs=pl.BlockSpec((tile_m, Dout_p), lambda i: (i, 0)),
            ),
            compiler_params=pltpu.CompilerParams(
                dimension_semantics=("parallel",),
                vmem_limit_bytes=vmem_limit,
            ),
        )(x2, w1p, b1p, w2p, b2p)
    else:
        # k-tiled fallback: hidden dim too large for weights-resident path.
        use_scratch = jnp.dtype(out_dtype) != jnp.dtype(jnp.float32)
        tile_m, tile_h, est = _pick_ktiled(M, Din_p, H_p, Dout_p, bpe, out_bpe,
                                           budget, tm_max, use_scratch)
        if small_vmem:
            tile_m = _ensure_two_tiles(tile_m, M)
            est = _est_ktiled(tile_m, tile_h, Din_p, Dout_p, bpe, out_bpe,
                              use_scratch)
        M_p = _round_up(M, tile_m)
        vmem_limit = int(min(limit_cap,
                             max(est + 8 * 1024 * 1024, 16 * 1024 * 1024)))
        x2, w1p, b1p, w2p, b2p = _pad_inputs(M_p)

        if use_scratch:
            kernel = partial(_mlp_ktiled_kernel_acc,
                             approximate_gelu=approximate_gelu,
                             precision=precision)
            scratch_shapes = [pltpu.VMEM((tile_m, Dout_p), jnp.float32)]
        else:
            kernel = partial(_mlp_ktiled_kernel_f32out,
                             approximate_gelu=approximate_gelu,
                             precision=precision)
            scratch_shapes = []

        out = pl.pallas_call(
            kernel,
            out_shape=jax.ShapeDtypeStruct((M_p, Dout_p), out_dtype),
            grid_spec=pltpu.PrefetchScalarGridSpec(
                num_scalar_prefetch=0,
                grid=(M_p // tile_m, H_p // tile_h),
                in_specs=[
                    pl.BlockSpec((tile_m, Din_p), lambda i, k: (i, 0)),
                    pl.BlockSpec((Din_p, tile_h), lambda i, k: (0, k)),
                    pl.BlockSpec((1, tile_h), lambda i, k: (0, k)),
                    pl.BlockSpec((tile_h, Dout_p), lambda i, k: (k, 0)),
                    pl.BlockSpec((1, Dout_p), lambda i, k: (0, 0)),
                ],
                out_specs=pl.BlockSpec((tile_m, Dout_p), lambda i, k: (i, 0)),
                scratch_shapes=scratch_shapes,
            ),
            compiler_params=pltpu.CompilerParams(
                dimension_semantics=("parallel", "arbitrary"),
                vmem_limit_bytes=vmem_limit,
            ),
        )(x2, w1p, b1p, w2p, b2p)

    return out[:M, :Dout].reshape(B, N, Dout)


def mlp_reference(x, w1, b1, w2, b2):
    h = x @ w1 + b1
    h = 0.5 * h * (1.0 + jax.lax.erf(h * _INV_SQRT2))
    return h @ w2 + b2


if __name__ == "__main__":
    # Small shapes consistent with the module: batch=2, seq=8, in=32,
    # hidden=64, out=32 (out_features defaults to in_features).
    B, N, D_IN, HID, D_OUT = 2, 8, 32, 64, 32

    key = jax.random.PRNGKey(0)
    kx, kw1, kb1, kw2, kb2 = jax.random.split(key, 5)

    x = jax.random.normal(kx, (B, N, D_IN), dtype=jnp.float32)

    # Deterministic PyTorch-Linear-like init, stored transposed: (in, out).
    lim1 = 1.0 / math.sqrt(D_IN)
    w1 = jax.random.uniform(kw1, (D_IN, HID), jnp.float32, -lim1, lim1)
    b1 = jax.random.uniform(kb1, (HID,), jnp.float32, -lim1, lim1)
    lim2 = 1.0 / math.sqrt(HID)
    w2 = jax.random.uniform(kw2, (HID, D_OUT), jnp.float32, -lim2, lim2)
    b2 = jax.random.uniform(kb2, (D_OUT,), jnp.float32, -lim2, lim2)

    y_ref = mlp_reference(x, w1, b1, w2, b2)

    # f32-operand path (HIGHEST MXU precision): tight parity with PyTorch f32.
    y_f32 = jax.block_until_ready(
        mlp_pallas(x, w1, b1, w2, b2, compute_dtype=jnp.float32))
    assert y_f32.shape == (B, N, D_OUT)
    assert jnp.allclose(y_f32, y_ref, atol=2e-5, rtol=2e-5)

    # Default bf16-operand / f32-accumulate fast path (weights-resident).
    y_bf = jax.block_until_ready(mlp_pallas(x, w1, b1, w2, b2))
    assert y_bf.shape == (B, N, D_OUT)
    assert bool(jnp.all(jnp.isfinite(y_bf)))
    assert float(jnp.max(jnp.abs(y_bf - y_ref))) < 0.2

    # Exercise the k-tiled (hidden-dim reduction) fallback path as well.
    y_kt = jax.block_until_ready(
        mlp_pallas(x, w1, b1, w2, b2, compute_dtype=jnp.float32,
                   force_ktiled=True))
    assert jnp.allclose(y_kt, y_ref, atol=2e-5, rtol=2e-5)

    print("KERNEL_OK")
</pallas_src>

<mosaic_0001>
module attributes {stable_mosaic.version = 11 : i64} {
  func.func @_mlp_resident_kernel(%arg0: i32, %arg1: memref<8x128xf32, #tpu.memory_space<vmem>>, %arg2: memref<128x128xf32, #tpu.memory_space<vmem>>, %arg3: memref<1x128xf32, #tpu.memory_space<vmem>>, %arg4: memref<128x128xf32, #tpu.memory_space<vmem>>, %arg5: memref<1x128xf32, #tpu.memory_space<vmem>>, %arg6: memref<8x128xf32, #tpu.memory_space<vmem>>) attributes {dimension_semantics = [#tpu.dimension_semantics<parallel>], iteration_bounds = array<i64: 2>, scalar_prefetch = 0 : i64, scratch_operands = 0 : i64, tpu.core_type = #tpu.core_type<tc>, window_params = [{transform_indices = @transform_0, window_bounds = array<i64: 8, 128>}, {pipeline_mode = #tpu.pipeline_mode<synchronous>, transform_indices = @transform_1, window_bounds = array<i64: 128, 128>}, {pipeline_mode = #tpu.pipeline_mode<synchronous>, transform_indices = @transform_2, window_bounds = array<i64: 1, 128>}, {pipeline_mode = #tpu.pipeline_mode<synchronous>, transform_indices = @transform_3, window_bounds = array<i64: 128, 128>}, {pipeline_mode = #tpu.pipeline_mode<synchronous>, transform_indices = @transform_4, window_bounds = array<i64: 1, 128>}, {transform_indices = @transform_5, window_bounds = array<i64: 8, 128>}]} {
    %c0 = arith.constant 0 : index
    %c0_0 = arith.constant 0 : index
    %0 = vector.load %arg1[%c0, %c0_0] : memref<8x128xf32, #tpu.memory_space<vmem>>, vector<8x128xf32>
    %c0_1 = arith.constant 0 : index
    %c0_2 = arith.constant 0 : index
    %1 = vector.load %arg2[%c0_1, %c0_2] : memref<128x128xf32, #tpu.memory_space<vmem>>, vector<128x128xf32>
    %cst = arith.constant dense<0.000000e+00> : vector<8x128xf32>
    %2 = tpu.matmul %0, %1, %cst {dimension_numbers = #tpu.dot_dimension_numbers<[1], [0], [0], [1], [0, 0, 1, 1], [], []>, precision = #tpu.contract_precision<fp32>} : vector<8x128xf32>, vector<128x128xf32>, vector<8x128xf32> -> vector<8x128xf32>
    %c0_3 = arith.constant 0 : index
    %c0_4 = arith.constant 0 : index
    %3 = vector.load %arg3[%c0_3, %c0_4] : memref<1x128xf32, #tpu.memory_space<vmem>>, vector<1x128xf32>
    %4 = vector.broadcast %3 : vector<1x128xf32> to vector<8x128xf32>
    %5 = arith.addf %2, %4 : vector<8x128xf32>
    %cst_5 = arith.constant 5.000000e-01 : f32
    %6 = vector.broadcast %cst_5 : f32 to vector<8x128xf32>
    %7 = arith.mulf %6, %5 : vector<8x128xf32>
    %cst_6 = arith.constant 0.707106769 : f32
    %8 = vector.broadcast %cst_6 : f32 to vector<8x128xf32>
    %9 = arith.mulf %5, %8 : vector<8x128xf32>
    %10 = math.erf %9 : vector<8x128xf32>
    %cst_7 = arith.constant 1.000000e+00 : f32
    %11 = vector.broadcast %cst_7 : f32 to vector<8x128xf32>
    %12 = arith.addf %11, %10 : vector<8x128xf32>
    %13 = arith.mulf %7, %12 : vector<8x128xf32>
    %c0_8 = arith.constant 0 : index
    %c0_9 = arith.constant 0 : index
    %14 = vector.load %arg4[%c0_8, %c0_9] : memref<128x128xf32, #tpu.memory_space<vmem>>, vector<128x128xf32>
    %cst_10 = arith.constant dense<0.000000e+00> : vector<8x128xf32>
    %15 = tpu.matmul %13, %14, %cst_10 {dimension_numbers = #tpu.dot_dimension_numbers<[1], [0], [0], [1], [0, 0, 1, 1], [], []>, precision = #tpu.contract_precision<fp32>} : vector<8x128xf32>, vector<128x128xf32>, vector<8x128xf32> -> vector<8x128xf32>
    %c0_11 = arith.constant 0 : index
    %c0_12 = arith.constant 0 : index
    %16 = vector.load %arg5[%c0_11, %c0_12] : memref<1x128xf32, #tpu.memory_space<vmem>>, vector<1x128xf32>
    %17 = vector.broadcast %16 : vector<1x128xf32> to vector<8x128xf32>
    %18 = arith.addf %15, %17 : vector<8x128xf32>
    %c0_13 = arith.constant 0 : index
    %c0_14 = arith.constant 0 : index
    %19 = vector.load %arg6[%c0_13, %c0_14] : memref<8x128xf32, #tpu.memory_space<vmem>>, vector<8x128xf32>
    tpu.vector_store %arg6[%c0_13, %c0_14], %18 {strides = array<i32>} : memref<8x128xf32, #tpu.memory_space<vmem>>, vector<8x128xf32>,
    return
  }
  func.func @transform_0(%arg0: i32) -> (i32, i32) {
    %c0_i32 = arith.constant 0 : i32
    %c0_i32_0 = arith.constant 0 : i32
    return %arg0, %c0_i32 : i32, i32
  }
  func.func @transform_1(%arg0: i32) -> (i32, i32) {
    %c0_i32 = arith.constant 0 : i32
    %c0_i32_0 = arith.constant 0 : i32
    %c0_i32_1 = arith.constant 0 : i32
    return %c0_i32, %c0_i32_0 : i32, i32
  }
  func.func @transform_2(%arg0: i32) -> (i32, i32) {
    %c0_i32 = arith.constant 0 : i32
    %c0_i32_0 = arith.constant 0 : i32
    %c0_i32_1 = arith.constant 0 : i32
    return %c0_i32, %c0_i32_0 : i32, i32
  }
  func.func @transform_3(%arg0: i32) -> (i32, i32) {
    %c0_i32 = arith.constant 0 : i32
    %c0_i32_0 = arith.constant 0 : i32
    %c0_i32_1 = arith.constant 0 : i32
    return %c0_i32, %c0_i32_0 : i32, i32
  }
  func.func @transform_4(%arg0: i32) -> (i32, i32) {
    %c0_i32 = arith.constant 0 : i32
    %c0_i32_0 = arith.constant 0 : i32
    %c0_i32_1 = arith.constant 0 : i32
    return %c0_i32, %c0_i32_0 : i32, i32
  }
  func.func @transform_5(%arg0: i32) -> (i32, i32) {
    %c0_i32 = arith.constant 0 : i32
    %c0_i32_0 = arith.constant 0 : i32
    return %arg0, %c0_i32 : i32, i32
  }
}

</mosaic_0001>

<bundles_post_ra>
// kernel: tpu_custom_call.1
= control target key start
LH: loop header
LB: loop body
LE: loop exit
PB: predicated region body
PF: predicated region fallthrough
CT: control target
= control target key end

     0   :  { %10 = vsyncpa [#allocation3], 0  ;;  %s3647_s0 = inlined_call_operand.hbm [shape: f32[16,128], index: 0, kind: input, shape index: {}]   ;;  %s3648_s1 = inlined_call_operand.hbm [shape: f32[128,128], index: 1, kind: input, shape index: {}]   ;;  %s3649_s2 = inlined_call_operand.vmem [shape: f32[1,128], index: 2, kind: input, shape index: {}]   ;;  %s3650_s3 = inlined_call_operand.hbm [shape: f32[128,128], index: 3, kind: input, shape index: {}]   ;;  %s3651_s4 = inlined_call_operand.vmem [shape: f32[1,128], index: 4, kind: input, shape index: {}]   ;;  %s3652_s5 = inlined_call_operand.hbm [shape: f32[16,128], index: 5, kind: output, shape index: {}]  }
   0x1   :  { %12 = vsyncpa [#allocation3 + $0x1], 0 }
   0x2   :  { %13 = vsyncpa [#allocation6], 0 }
   0x3   :  { %14 = vsyncpa [#allocation4], 0 }
   0x4   :  { %16 = vsyncpa [#allocation4 + $0x1], 0  ;;  %s2930_s18 = smov 0   ;;  %s2932_s19 = smov 0  }
   0x5   :  { %s2934_s20 = smov 0   ;;  %s2936_s21 = smov 0  }
   0x6 LB: > { %s2951_s22 = sadd.s32 4294967295, %s2889_s21   ;;  %s1707_s23 = sadd.s32 4294967294, %s2889_s21   ;;  %s2889_s21 = sphi %s2936_s21, %s3688_s21   ;;  %s2885_s20 = sphi %s2934_s20, %s3687_s20   ;;  %s2881_s19 = sphi %s2932_s19, %s3686_s19   ;;  %s2877_s18 = sphi %s2930_s18, %s3685_s18  }
   0x7   : > { %p42_p0 = scmp.ne.s32.totalorder %s2881_s19, %s2877_s18  ;;  %p3653_p1 = scmp.eq.s32.totalorder %s2951_s22, 0 }
   0x8   : > { %p156_p3 = scmp.eq.s32.totalorder %s1707_s23, 1  ;;  %p1708_p5 = scmp.ge.s32.totalorder %s2889_s21, 1 }
   0x9   : > { %p2960_p4 = por %p3653_p1, %p42_p0  ;;  %p163_p7 = scmp.lt.s32.totalorder %s2889_s21, 3 }
   0xa   : > { %p2965_p6 = por %p156_p3, %p42_p0  ;;  %s2891_s27 = smov [#allocation5]  }
   0xb   : > { %s3664_s24 = scalar_select %p2960_p4, 1, 0 }
   0xc   : > { %s3665_s25 = scalar_select %p2965_p6, 1, 0 }
   0xd   : > { %p2970_p8 = pnand %p1708_p5, %p163_p7  ;;  %s175_s28 = sshll.u32 %s2891_s27, 4  ;;  %s2974_s28 = int_to_ptr.vmem [resolvable:$true] %s175_s28 }
   0xe   : > { %s2892_s30 = smov [#allocation7]   ;;  %s2733_s9 = scalar_lea.hbm %s3648_s1, 2048 }
   0xf   : > { %p2671_p9 = pneg %p2970_p8  ;;  %s191_s6 = sshll.u32 %s2892_s30, 4  ;;  %s2985_s6 = int_to_ptr.vmem [resolvable:$true] %s191_s6 }
  0x10   : > { %p2734_p12 = scmp.ne.s32.totalorder %s3648_s1, %s2733_s9  ;;  %p2740_p5 = scmp.lt.u32.totalorder %s2733_s9, %s3648_s1 }
  0x11   : > { %p2981_p11 = pnand %p2671_p9, %p3653_p1 }
  0x13   : > { %p2735_p13 = pneg %p2981_p11 }
  0x15   : > { %p2736_p0 = pnand %p2735_p13, %p2734_p12 }
  0x17   : > { %p2737_p3 = pneg %p2736_p0 }
  0x19   : > { %p2742_p7 = pnand %p2740_p5, %p2737_p3 }
  0x1b   : > { %2745 = shalt.err (!%p2742_p7)
}
  0x1c   : > { %s2746_s14 = scalar_lea.vmem %s2974_s28, 2048  ;;  %p2754_p2 = scmp.lt.s32.totalorder %s2974_s28, %s2974_s28 }
  0x1d   : > { %p2747_p9 = scmp.ne.s32.totalorder %s2974_s28, %s2746_s14  ;;  %p2755_p12 = scmp.lt.s32.totalorder %s2746_s14, %s2746_s14 }
  0x1f   : > { %p2749_p10 = pnand %p2747_p9, %p2735_p13  ;;  %p2756_p0 = por %p2755_p12, %p2754_p2 }
  0x21   : > { %p2750_p1 = pneg %p2749_p10 }
  0x23   : > { %p2757_p6 = pnand %p2756_p0, %p2750_p1 }
  0x25   : > { %2760 = shalt.err (!%p2757_p6)
}
  0x26   : > { %s2893_s15 = smov 128   ;;  %s2894_s16 = smov 8  }
  0x27   : > { %2674 = dma.hbm_to_vmem [thread:$0]  (!%p2981_p11), %s3648_s1, 2048, %s2974_s28, [#allocation6], %s2893_s15, %s2893_s15, %s2894_s16  }
  0x28   : > { %s2761_s7 = scalar_lea.hbm %s3650_s3, 2048 }
  0x29   : > { %p2762_p2 = scmp.ne.s32.totalorder %s3650_s3, %s2761_s7  ;;  %p2768_p10 = scmp.lt.u32.totalorder %s2761_s7, %s3650_s3 }
  0x2b   : > { %p2764_p1 = pnand %p2762_p2, %p2735_p13 }
  0x2d   : > { %p2765_p6 = pneg %p2764_p1 }
  0x2f   : > { %p2770_p3 = pnand %p2768_p10, %p2765_p6 }
  0x31   : > { %2773 = shalt.err (!%p2770_p3)
}
  0x32   : > { %s2774_s28 = scalar_lea.vmem %s2985_s6, 2048  ;;  %p2782_p12 = scmp.lt.s32.totalorder %s2985_s6, %s2985_s6 }
  0x33   : > { %p2775_p5 = scmp.ne.s32.totalorder %s2985_s6, %s2774_s28  ;;  %p2783_p0 = scmp.lt.s32.totalorder %s2774_s28, %s2774_s28 }
  0x35   : > { %p2777_p7 = pnand %p2775_p5, %p2735_p13  ;;  %p2784_p2 = por %p2783_p0, %p2782_p12 }
  0x37   : > { %p2778_p9 = pneg %p2777_p7 }
  0x39   : > { %p2785_p1 = pnand %p2784_p2, %p2778_p9 }
  0x3b   : > { %2788 = shalt.err (!%p2785_p1)
}
  0x3c   : > { %2677 = dma.hbm_to_vmem [thread:$0]  (!%p2981_p11), %s3650_s3, 2048, %s2985_s6, [#allocation6], %s2893_s15, %s2893_s15, %s2894_s16  }
  0x3d   : > { %s3040_s14 = sadd.s32 1, %s2889_s21   ;;  %s29_s29 = sadd.s32 1, %s2885_s20 }
  0x3e   : > { %s26_s17 = ssub.s32 %s2889_s21, %s3040_s14  ;;  %p36_p13 = scmp.ne.s32.totalorder %s2885_s20, %s2881_s19 }
  0x3f   : > { %p27_p6 = scmp.eq.s32.totalorder %s26_s17, 0  ;;  %p37_p10 = scmp.eq.s32.totalorder %s2889_s21, 0 }
  0x40   : > { %p3668_p3 = scmp.eq.s32.totalorder %s2951_s22, 1  ;;  %p2688_p7 = scmp.lt.s32.totalorder %s2889_s21, 2 }
  0x41   : > { %s3056_s27 = scalar_select %p27_p6, %s2885_s20, %s29_s29  }
  0x42   : > { %p3050_p5 = por %p3668_p3, %p36_p13  ;;  %p38_p9 = por %p37_p10, %p36_p13 }
  0x43   : > { %s208_s30 = sand.u32 1, %s2885_s20   ;;  %s1713_s6 = sshll.u32 %s2889_s21, 7 }
  0x44   : > { %s3669_s23 = scalar_select %p3050_p5, 1, 0 }
  0x45   : > { %s1712_s7 = sshll.u32 %s208_s30, 3  ;;  %s3063_s8 = scalar_lea.hbm %s3647_s0, %s1713_s6 }
  0x46   : > { %s212_s9 = scalar_lea.vmem [#allocation2], %s1712_s7  ;;  %p3067_p11 = pnand %p2688_p7, %p38_p9 }
  0x47   : > { %s219_s10 = sshll.u32 %s212_s9, 4  ;;  %s209_s28 = scalar_lea.sflag [#allocation3], %s208_s30  ;;  %s3065_s10 = int_to_ptr.vmem [resolvable:$true] %s219_s10 }
  0x48   : > { %s2789_s12 = scalar_lea.hbm %s3063_s8, 128  ;;  %p2791_p0 = pneg %p3067_p11 }
  0x49   : > { %p2790_p12 = scmp.ne.s32.totalorder %s3063_s8, %s2789_s12  ;;  %s2794_s17 = scalar_lea.hbm %s3647_s0, 256 }
  0x4a   : > { %p2795_p13 = scmp.lt.u32.totalorder %s3063_s8, %s3647_s0  ;;  %p2796_p6 = scmp.lt.u32.totalorder %s2794_s17, %s2789_s12 }
  0x4b   : > { %p2792_p2 = pnand %p2791_p0, %p2790_p12  ;;  %p2798_p3 = scmp.lt.u32.totalorder %s2789_s12, %s3063_s8 }
  0x4c   : > { %p2797_p10 = por %p2796_p6, %p2795_p13 }
  0x4d   : > { %p2793_p1 = pneg %p2792_p2 }
  0x4e   : > { %p2799_p7 = por %p2798_p3, %p2797_p10 }
  0x50   : > { %p2800_p9 = pnand %p2799_p7, %p2793_p1 }
  0x52   : > { %2803 = shalt.err (!%p2800_p9)
}
  0x53   : > { %s2804_s30 = scalar_lea.vmem %s3065_s10, 128  ;;  %s2895_s15 = smov [#allocation2]  }
  0x54   : > { %p2805_p12 = scmp.ne.s32.totalorder %s3065_s10, %s2804_s30  ;;  %s2809_s16 = sshll.u32 %s2895_s15, 4  ;;  %s2810_s16 = int_to_ptr.vmem [resolvable:$false] %s2809_s16 }
  0x55   : > { %s2811_s9 = scalar_lea.vmem %s2810_s16, 256  ;;  %p2812_p4 = scmp.lt.s32.totalorder %s3065_s10, %s2810_s16 }
  0x56   : > { %p2807_p2 = pnand %p2805_p12, %p2791_p0  ;;  %p2813_p13 = scmp.lt.s32.totalorder %s2811_s9, %s2804_s30 }
  0x58   : > { %p2808_p5 = pneg %p2807_p2  ;;  %p2814_p6 = por %p2813_p13, %p2812_p4 }
  0x5a   : > { %p2815_p10 = pnand %p2814_p6, %p2808_p5 }
  0x5c   : > { %2818 = shalt.err (!%p2815_p10)
}
  0x5d   : > { %2681 = dma.hbm_to_vmem [thread:$0]  (!%p3067_p11), %s3063_s8, 128, %s3065_s10, %s209_s28  }
  0x5e   : > { %228 = sbr.rel (%p2970_p8) target bundleno = 930 (0x3a2), region = 40  ;;  %s3099_s12 = sand.u32 (!%p2970_p8), 1, %s2881_s19  }
  0x5f   : > { %s1715_s13 = sshll.u32 (!%p2970_p8), %s3099_s12, 3  ;;  %s231_s29 = scalar_lea.sflag (!%p2970_p8), [#allocation3], %s3099_s12 }
  0x60   : > { %s3105_s17 = scalar_lea.vmem (!%p2970_p8), [#allocation2], %s1715_s13  ;;  %p3671_p4 = scmp.ne.s32.totalorder (!%p2970_p8), %s3664_s24, 0 }
  0x65   : > { %2864 = dma.done.wait (%p3671_p4), %s231_s29, 128  }
  0x66   : > { %2866 = vsyncadd (%p3671_p4), %s231_s29, 4294967168  ;;  %p3672_p5 = scmp.eq.s32.totalorder %s2951_s22, 0 }
  0x68   : > { %2868 = dma.done.wait (%p3672_p5), [#allocation6], 4096   ;;  %p3673_p8 = pmov %p3672_p5 }
  0x69   : > { %v2896_v0 = vmov 0.0|0.0   ;;  %vm2897_vm0 = vmmov 0   ;;  %v2898_v1 = vmov 0.0   ;;  %v270_v2 = vld [vmem:[#allocation5] sm:$0xff]  ;;  %v271_v3 = vld [vmem:[#allocation5 + $0x8] sm:$0xff]  ;;  %v272_v4 = vld [vmem:[#allocation5 + $0x10] sm:$0xff] }
  0x6a   : > { %2870 = vsyncadd (%p3673_p8), [#allocation6], 4294963200  ;;  %2349 = vmatprep.subr.bf16.mxu0 %v2896_v0  ;;  %1961 = vmatprep.mubr.msk.f32.mxu0 %vm2897_vm0, %v2898_v1  ;;  %v294_v5 = vand.u32 4294901760, %v270_v2  ;;  %v297_v6 = vand.u32 4294901760, %v271_v3  ;;  %v273_v7 = vld [vmem:[#allocation5 + $0x18] sm:$0xff]  ;;  %v300_v8 = vand.u32 4294901760, %v272_v4 }
  0x6b   : > { %2493 = vmatprep.subr.bf16.mxu1 %v2896_v0  ;;  %2171 = vmatprep.mubr.msk.f32.mxu1 %vm2897_vm0, %v2898_v1  ;;  %v303_v9 = vand.u32 4294901760, %v273_v7  ;;  %v274_v10 = vld [vmem:[#allocation5 + $0x20] sm:$0xff]  ;;  %v275_v11 = vld [vmem:[#allocation5 + $0x28] sm:$0xff]  ;;  %v276_v16 = vld [vmem:[#allocation5 + $0x30] sm:$0xff]  ;;  %s1722_s11 = sshll.u32 %s2951_s22, 7  ;;  %s268_s28 = scalar_lea.vmem [#allocation8], %s1715_s13 }
  0x6c   : > { %v3121_v12 = vpack.c.bf16 %v297_v6, %v294_v5  ;;  %v306_v14 = vand.u32 4294901760, %v274_v10  ;;  %v309_v15 = vand.u32 4294901760, %v275_v11  ;;  %v277_v17 = vld [vmem:[#allocation5 + $0x38] sm:$0xff]  ;;  %v312_v19 = vand.u32 4294901760, %v276_v16  ;;  %v278_v21 = vld [vmem:[#allocation5 + $0x40] sm:$0xff]  ;;  %v279_v22 = vld [vmem:[#allocation5 + $0x48] sm:$0xff]  ;;  %s3603_s15 = scalar_lea.hbm %s3652_s5, %s1722_s11 }
  0x6d   : > { %v3124_v13 = vpack.c.bf16 %v303_v9, %v300_v8  ;;  %v315_v20 = vand.u32 4294901760, %v277_v17  ;;  %v269_v23 = vld [vmem:[%s3105_s17] sm:$0xff]  ;;  %v3132_v24 = vsub.f32 %v270_v2, %v294_v5  ;;  %v3134_v25 = vsub.f32 %v271_v3, %v297_v6  ;;  %v282_v32 = vld [vmem:[#allocation5 + $0x60] sm:$0xff]  ;;  %v283_v35 = vld [vmem:[#allocation5 + $0x68] sm:$0xff]  ;;  %s1618_s7 = sshll.u32 %s268_s28, 4  ;;  %s1605_s16 = scalar_lea.sflag [#allocation4], %s3099_s12  ;;  %s3605_s7 = int_to_ptr.vmem [resolvable:$true] %s1618_s7 }
  0x6e   : > { %2351 = vmatpush3.bf16.msra.mxu0 %v3121_v12  ;;  %v3128_v18 = vpack.c.bf16 %v309_v15, %v306_v14  ;;  %v318_v27 = vand.u32 4294901760, %v278_v21  ;;  %v321_v28 = vand.u32 4294901760, %v279_v22  ;;  %v280_v29 = vld [vmem:[#allocation5 + $0x50] sm:$0xff]  ;;  %v281_v30 = vld [vmem:[#allocation5 + $0x58] sm:$0xff]  ;;  %v3140_v31 = vand.u32 4294901760, %v269_v23  ;;  %s2819_s9 = scalar_lea.vmem %s3605_s7, 128 }
  0x6f   : > { %2352 = vmatprep.subr.bf16.mxu0 %v2896_v0  ;;  %v3137_v26 = vpack.c.bf16 %v315_v20, %v312_v19  ;;  %v3142_v33 = vsub.f32 %v272_v4, %v300_v8  ;;  %v324_v34 = vand.u32 4294901760, %v280_v29  ;;  %v284_v36 = vld [vmem:[#allocation5 + $0x70] sm:$0xff]  ;;  %v285_v37 = vld [vmem:[#allocation5 + $0x78] sm:$0xff]  ;;  %v327_v39 = vand.u32 4294901760, %v281_v30  ;;  %p2820_p11 = scmp.ne.s32.totalorder %s3605_s7, %s2819_s9  ;;  %p3682_p0 = scmp.ne.s32.totalorder %s3669_s23, 0 }
  0x70   : > { %v3145_v38 = vpack.c.bf16 %v321_v28, %v318_v27  ;;  %v387_v40 = vand.u32 4294901760, %v3132_v24  ;;  %v394_v41 = vand.u32 4294901760, %v3134_v25  ;;  %v3149_v42 = vsub.f32 %v273_v7, %v303_v9  ;;  %s2899_s22 = smov [#allocation8]  }
  0x71   : > { %v3151_v43 = vsub.f32 %v274_v10, %v306_v14  ;;  %v3153_v44 = vsub.f32 %v275_v11, %v309_v15  ;;  %v3157_v45 = vsub.f32 %v269_v23, %v3140_v31  ;;  %v330_v46 = vand.u32 4294901760, %v282_v32  ;;  %p2821_p1 = pnand %p2820_p11, %p3682_p0  ;;  %s2823_s13 = sshll.u32 %s2899_s22, 4  ;;  %s2824_s13 = int_to_ptr.vmem [resolvable:$false] %s2823_s13 }
  0x72   : > { %2354 = vmatpush3.bf16.msra.mxu0 %v3124_v13  ;;  %v333_v47 = vand.u32 4294901760, %v283_v35  ;;  %v336_v48 = vand.u32 4294901760, %v284_v36  ;;  %v339_v49 = vand.u32 4294901760, %v285_v37  ;;  %v3159_v50 = vsub.f32 %v276_v16, %v312_v19  ;;  %s2825_s29 = scalar_lea.vmem %s2824_s13, 256  ;;  %p2826_p7 = scmp.lt.s32.totalorder %s3605_s7, %s2824_s13 }
  0x73   : > { %2355 = vmatprep.subr.bf16.mxu0 %v2896_v0  ;;  %v3161_v51 = vsub.f32 %v277_v17, %v315_v20  ;;  %v3163_v52 = vsub.f32 %v278_v21, %v318_v27  ;;  %v401_v53 = vand.u32 4294901760, %v3142_v33  ;;  %v3167_v54 = vsub.f32 %v279_v22, %v321_v28  ;;  %p2822_p3 = pneg %p2821_p1  ;;  %p2827_p9 = scmp.lt.s32.totalorder %s2825_s29, %s2819_s9 }
  0x74   : > { %v3169_v55 = vpack.c.bf16 %v327_v39, %v324_v34  ;;  %v388_v56 = vsub.f32 %v3132_v24, %v387_v40  ;;  %v395_v57 = vsub.f32 %v3134_v25, %v394_v41  ;;  %v3174_v58 = vsub.f32 %v280_v29, %v324_v34 }
  0x75   : > { %v3176_v59 = vsub.f32 %v281_v30, %v327_v39  ;;  %v3178_v60 = vsub.f32 %v282_v32, %v330_v46  ;;  %v376_v61 = vand.u32 4294901760, %v3157_v45  ;;  %v3181_v62 = vpack.c.bf16 %v333_v47, %v330_v46  ;;  %p2828_p12 = por %p2827_p9, %p2826_p7 }
  0x76   : > { %2357 = vmatpush3.bf16.msra.mxu0 %v3128_v18  ;;  %v3183_v63 = vsub.f32 %v283_v35, %v333_v47  ;;  %v3185_v2 = vpack.c.bf16 %v339_v49, %v336_v48  ;;  %v3187_v3 = vsub.f32 %v284_v36, %v336_v48  ;;  %v3189_v4 = vsub.f32 %v285_v37, %v339_v49 }
  0x77   : > { %2358 = vmatprep.subr.bf16.mxu0 %v2896_v0  ;;  %v402_v5 = vsub.f32 %v3142_v33, %v401_v53  ;;  %v408_v6 = vand.u32 4294901760, %v3149_v42  ;;  %v415_v7 = vand.u32 4294901760, %v3151_v43  ;;  %v389_v8 = vand.u32 4294901760, %v388_v56  ;;  %p2829_p2 = pnand %p2828_p12, %p2822_p3 }
  0x78   : > { %v396_v9 = vand.u32 4294901760, %v395_v57  ;;  %v422_v10 = vand.u32 4294901760, %v3153_v44  ;;  %v429_v11 = vand.u32 4294901760, %v3159_v50  ;;  %v377_v14 = vsub.f32 %v3157_v45, %v376_v61 }
  0x79   : > { %v436_v15 = vand.u32 4294901760, %v3161_v51  ;;  %v443_v16 = vand.u32 4294901760, %v3163_v52  ;;  %v450_v17 = vand.u32 4294901760, %v3167_v54  ;;  %v457_v19 = vand.u32 4294901760, %v3174_v58 }
  0x7a   : > { %2360 = vmatpush3.bf16.msra.mxu0 %v3137_v26  ;;  %v464_v20 = vand.u32 4294901760, %v3176_v59  ;;  %v471_v21 = vand.u32 4294901760, %v3178_v60  ;;  %v478_v22 = vand.u32 4294901760, %v3183_v63  ;;  %v485_v23 = vand.u32 4294901760, %v3187_v3 }
  0x7b   : > { %2361 = vmatprep.subr.bf16.mxu0 %v2896_v0  ;;  %v492_v27 = vand.u32 4294901760, %v3189_v4  ;;  %v3210_v28 = vpack.c.bf16 %v394_v41, %v387_v40  ;;  %v3212_v29 = vpack.c.bf16 %v408_v6, %v401_v53  ;;  %v409_v30 = vsub.f32 %v3149_v42, %v408_v6 }
  0x7c   : > { %v3216_v32 = vpack.c.bf16 %v422_v10, %v415_v7  ;;  %v3218_v34 = vpack.c.bf16 %v436_v15, %v429_v11  ;;  %v3220_v35 = vpack.c.bf16 %v450_v17, %v443_v16  ;;  %v3223_v36 = vpack.c.bf16 %v464_v20, %v457_v19 }
  0x7d   : > { %v3225_v37 = vpack.c.bf16 %v478_v22, %v471_v21  ;;  %v3227_v39 = vpack.c.bf16 %v492_v27, %v485_v23  ;;  %v378_v40 = vand.u32 4294901760, %v377_v14  ;;  %v403_v41 = vand.u32 4294901760, %v402_v5 }
  0x7e   : > { %2363 = vmatpush3.bf16.msra.mxu0 %v3145_v38  ;;  %v2374_v46 = vpack.c.bf16 %v396_v9, %v389_v8  ;;  %v410_v47 = vand.u32 4294901760, %v409_v30  ;;  %v416_v48 = vsub.f32 %v3151_v43, %v415_v7  ;;  %v423_v49 = vsub.f32 %v3153_v44, %v422_v10 }
  0x7f   : > { %2364 = vmatprep.subr.bf16.mxu0 %v2896_v0  ;;  %v430_v53 = vsub.f32 %v3159_v50, %v429_v11  ;;  %v437_v14 = vsub.f32 %v3161_v51, %v436_v15  ;;  %v444_v5 = vsub.f32 %v3163_v52, %v443_v16  ;;  %v451_v10 = vsub.f32 %v3167_v54, %v450_v17 }
  0x80   : > { %v2377_v56 = vpack.c.bf16 %v410_v47, %v403_v41  ;;  %v417_v57 = vand.u32 4294901760, %v416_v48  ;;  %v424_v6 = vand.u32 4294901760, %v423_v49  ;;  %v458_v15 = vsub.f32 %v3174_v58, %v457_v19 }
  0x81   : > { %v431_v8 = vand.u32 4294901760, %v430_v53  ;;  %v438_v9 = vand.u32 4294901760, %v437_v14  ;;  %v445_v11 = vand.u32 4294901760, %v444_v5  ;;  %v465_v41 = vsub.f32 %v3176_v59, %v464_v20 }
  0x82   : > { %2366 = vmatpush3.bf16.msra.mxu0 %v3169_v55  ;;  %v2380_v7 = vpack.c.bf16 %v424_v6, %v417_v57  ;;  %v472_v16 = vsub.f32 %v3178_v60, %v471_v21  ;;  %v459_v47 = vand.u32 4294901760, %v458_v15  ;;  %v479_v17 = vsub.f32 %v3183_v63, %v478_v22 }
  0x83   : > { %2367 = vmatprep.subr.bf16.mxu0 %v2896_v0  ;;  %v2383_v30 = vpack.c.bf16 %v438_v9, %v431_v8  ;;  %v466_v48 = vand.u32 4294901760, %v465_v41  ;;  %v486_v19 = vsub.f32 %v3187_v3, %v485_v23  ;;  %v493_v20 = vsub.f32 %v3189_v4, %v492_v27  ;;  %v939_v23 = vld [vmem:[#allocation7] sm:$0xff]  ;;  %v940_v27 = vld [vmem:[#allocation7 + $0x8] sm:$0xff] }
  0x84   : > { %v473_v49 = vand.u32 4294901760, %v472_v16  ;;  %v2398_v14 = vpack.c.bf16 %v3134_v25, %v3132_v24  ;;  %v2401_v5 = vpack.c.bf16 %v3149_v42, %v3142_v33  ;;  %v966_v8 = vand.u32 4294901760, %v940_v27 }
  0x85   : > { %v2389_v53 = vpack.c.bf16 %v466_v48, %v459_v47  ;;  %v487_v57 = vand.u32 4294901760, %v486_v19  ;;  %v494_v6 = vand.u32 4294901760, %v493_v20  ;;  %v2407_v33 = vpack.c.bf16 %v3161_v51, %v3159_v50  ;;  %v944_v51 = vld [vmem:[#allocation7 + $0x28] sm:$0xff]  ;;  %v954_v47 = vld [vmem:[#allocation7 + $0x78] sm:$0xff] }
  0x86   : > { %2369 = vmatpush3.bf16.msra.mxu0 %v3181_v62  ;;  %v3265_v25 = vsub.f32 %v940_v27, %v966_v8  ;;  %v2410_v42 = vpack.c.bf16 %v3167_v54, %v3163_v52  ;;  %v2419_v50 = vpack.c.bf16 %v3189_v4, %v3187_v3  ;;  %v978_v54 = vand.u32 4294901760, %v944_v51 }
  0x87   : > { %2370 = vmatprep.subr.bf16.mxu0 %v2896_v0  ;;  %v2395_v22 = vpack.c.bf16 %v494_v6, %v487_v57  ;;  %v1008_v6 = vand.u32 4294901760, %v954_v47 }
  0x88   : > { %v3374_v16 = vsub.f32 %v944_v51, %v978_v54 }
  0x8a   : > { %2372 = vmatpush3.bf16.msra.mxu0 %v3185_v2 }
  0x8b   : > { %2373 = vmatprep.subr.bf16.mxu0 %v2896_v0 }
  0x8d   : > { %1962 = vmatmul.mubr.f32.vlgmr.msra.gmra.mrb[0].mxu0 %v378_v40  ;;  %v452_v40 = vand.u32 4294901760, %v451_v10  ;;  %v2404_v10 = vpack.c.bf16 %v3153_v44, %v3151_v43  ;;  %v2413_v43 = vpack.c.bf16 %v3176_v59, %v3174_v58  ;;  %v2416_v44 = vpack.c.bf16 %v3183_v63, %v3178_v60  ;;  %v945_v58 = vld [vmem:[#allocation7 + $0x30] sm:$0xff]  ;;  %v946_v59 = vld [vmem:[#allocation7 + $0x38] sm:$0xff]  ;;  %v948_v63 = vld [vmem:[#allocation7 + $0x48] sm:$0xff] }
  0x8e   : > { %2375 = vmatpush3.bf16.msra.mxu0 %v2374_v46  ;;  %1996 = vmatprep.mubr.msk.f32.mxu0 %vm2897_vm0, %v2898_v1  ;;  %v984_v60 = vand.u32 4294901760, %v946_v59  ;;  %v990_v3 = vand.u32 4294901760, %v948_v63 }
  0x8f   : > { %2376 = vmatprep.subr.bf16.mxu0 %v2896_v0  ;;  %v2386_v46 = vpack.c.bf16 %v452_v40, %v445_v11 }
  0x92   : > { %2378 = vmatpush3.bf16.msra.mxu0 %v2377_v56  ;;  %v480_v56 = vand.u32 4294901760, %v479_v17  ;;  %v3379_v17 = vsub.f32 %v946_v59, %v984_v60 }
  0x93   : > { %2379 = vmatprep.subr.bf16.mxu0 %v2896_v0 }
  0x94   : > { %v2392_v21 = vpack.c.bf16 %v480_v56, %v473_v49 }
  0x96   : > { %2381 = vmatpush3.bf16.msra.mxu0 %v2380_v7  ;;  %v963_v7 = vand.u32 4294901760, %v939_v23 }
  0x97   : > { %2382 = vmatprep.subr.bf16.mxu0 %v2896_v0 }
  0x98   : > { %v3261_v9 = vpack.c.bf16 %v966_v8, %v963_v7  ;;  %v3263_v24 = vsub.f32 %v939_v23, %v963_v7 }
  0x9a   : > { %2384 = vmatpush3.bf16.msra.mxu0 %v2383_v30  ;;  %2495 = vmatpush3.bf16.msra.mxu1 %v3261_v9 }
  0x9b   : > { %2385 = vmatprep.subr.bf16.mxu0 %v2896_v0  ;;  %2496 = vmatprep.subr.bf16.mxu1 %v2896_v0 }
  0x9e   : > { %2387 = vmatpush3.bf16.msra.mxu0 %v2386_v46  ;;  %v953_v46 = vld [vmem:[#allocation7 + $0x70] sm:$0xff] }
  0x9f   : > { %2388 = vmatprep.subr.bf16.mxu0 %v2896_v0  ;;  %v1005_v57 = vand.u32 4294901760, %v953_v46 }
  0xa1   : > { %v3396_v23 = vpack.c.bf16 %v1008_v6, %v1005_v57  ;;  %v3398_v27 = vsub.f32 %v953_v46, %v1005_v57 }
  0xa2   : > { %2390 = vmatpush3.bf16.msra.mxu0 %v2389_v53  ;;  %v3383_v53 = vsub.f32 %v948_v63, %v990_v3 }
  0xa3   : > { %2391 = vmatprep.subr.bf16.mxu0 %v2896_v0 }
  0xa6   : > { %2393 = vmatpush3.bf16.msra.mxu0 %v2392_v21 }
  0xa7   : > { %2394 = vmatprep.subr.bf16.mxu0 %v2896_v0 }
  0xaa   : > { %2396 = vmatpush3.bf16.msra.mxu0 %v2395_v22  ;;  %v1056_v22 = vand.u32 4294901760, %v3263_v24 }
  0xab   : > { %2397 = vmatprep.subr.bf16.mxu0 %v2896_v0 }
  0xac   : > { %v1057_v7 = vsub.f32 %v3263_v24, %v1056_v22 }
  0xad   : > { %1997 = vmatmul.mubr.f32.vlgmr.msra.gmra.mrb[0].mxu0 %v3140_v31 }
  0xae   : > { %2399 = vmatpush3.bf16.msra.mxu0 %v2398_v14  ;;  %2031 = vmatprep.mubr.msk.f32.mxu0 %vm2897_vm0, %v2898_v1  ;;  %v1063_v14 = vand.u32 4294901760, %v3265_v25 }
  0xaf   : > { %2400 = vmatprep.subr.bf16.mxu0 %v2896_v0 }
  0xb0   : > { %v1064_v8 = vsub.f32 %v3265_v25, %v1063_v14 }
  0xb2   : > { %2402 = vmatpush3.bf16.msra.mxu0 %v2401_v5  ;;  %v3400_v5 = vsub.f32 %v954_v47, %v1008_v6 }
  0xb3   : > { %2403 = vmatprep.subr.bf16.mxu0 %v2896_v0 }
  0xb6   : > { %2405 = vmatpush3.bf16.msra.mxu0 %v2404_v10 }
  0xb7   : > { %2406 = vmatprep.subr.bf16.mxu0 %v2896_v0 }
  0xba   : > { %2408 = vmatpush3.bf16.msra.mxu0 %v2407_v33 }
  0xbb   : > { %2409 = vmatprep.subr.bf16.mxu0 %v2896_v0 }
  0xbe   : > { %2411 = vmatpush3.bf16.msra.mxu0 %v2410_v42  ;;  %v1058_v42 = vand.u32 4294901760, %v1057_v7 }
  0xbf   : > { %2412 = vmatprep.subr.bf16.mxu0 %v2896_v0 }
  0xc2   : > { %2414 = vmatpush3.bf16.msra.mxu0 %v2413_v43  ;;  %v1065_v43 = vand.u32 4294901760, %v1064_v8 }
  0xc3   : > { %2415 = vmatprep.subr.bf16.mxu0 %v2896_v0 }
  0xc6   : > { %2417 = vmatpush3.bf16.msra.mxu0 %v2416_v44 }
  0xc7   : > { %2418 = vmatprep.subr.bf16.mxu0 %v2896_v0 }
  0xca   : > { %2420 = vmatpush3.bf16.msra.mxu0 %v2419_v50 }
  0xcb   : > { %2421 = vmatprep.subr.bf16.mxu0 %v2896_v0 }
  0xcd   : > { %2032 = vmatmul.mubr.f32.vlgmr.msra.gmra.mrb[0].mxu0 %v3157_v45 }
  0xce   : > { %2423 = vmatpush3.bf16.msra.mxu0 %v3121_v12  ;;  %2066 = vmatprep.mubr.msk.f32.mxu0 %vm2897_vm0, %v2898_v1 }
  0xcf   : > { %2424 = vmatprep.subr.bf16.mxu0 %v2896_v0 }
  0xd2   : > { %2426 = vmatpush3.bf16.msra.mxu0 %v3124_v13 }
  0xd3   : > { %2427 = vmatprep.subr.bf16.mxu0 %v2896_v0 }
  0xd6   : > { %2429 = vmatpush3.bf16.msra.mxu0 %v3128_v18 }
  0xd7   : > { %2430 = vmatprep.subr.bf16.mxu0 %v2896_v0 }
  0xda   : > { %2432 = vmatpush3.bf16.msra.mxu0 %v3137_v26 }
  0xdb   : > { %2433 = vmatprep.subr.bf16.mxu0 %v2896_v0 }
  0xde   : > { %2435 = vmatpush3.bf16.msra.mxu0 %v3145_v38 }
  0xdf   : > { %2436 = vmatprep.subr.bf16.mxu0 %v2896_v0 }
  0xe2   : > { %2438 = vmatpush3.bf16.msra.mxu0 %v3169_v55 }
  0xe3   : > { %2439 = vmatprep.subr.bf16.mxu0 %v2896_v0 }
  0xe6   : > { %2441 = vmatpush3.bf16.msra.mxu0 %v3181_v62 }
  0xe7   : > { %2442 = vmatprep.subr.bf16.mxu0 %v2896_v0 }
  0xea   : > { %2444 = vmatpush3.bf16.msra.mxu0 %v3185_v2 }
  0xeb   : > { %2445 = vmatprep.subr.bf16.mxu0 %v2896_v0 }
  0xed   : > { %2067 = vmatmul.mubr.f32.vlgmr.msra.gmra.mrb[0].mxu0 %v376_v61 }
  0xee   : > { %2447 = vmatpush3.bf16.msra.mxu0 %v3210_v28  ;;  %2101 = vmatprep.mubr.msk.f32.mxu0 %vm2897_vm0, %v2898_v1  ;;  %v949_v28 = vld [vmem:[#allocation7 + $0x50] sm:$0xff] }
  0xef   : > { %2448 = vmatprep.subr.bf16.mxu0 %v2896_v0 }
  0xf2   : > { %2450 = vmatpush3.bf16.msra.mxu0 %v3212_v29  ;;  %v950_v29 = vld [vmem:[#allocation7 + $0x58] sm:$0xff] }
  0xf3   : > { %2451 = vmatprep.subr.bf16.mxu0 %v2896_v0 }
  0xf6   : > { %2453 = vmatpush3.bf16.msra.mxu0 %v3216_v32  ;;  %v993_v32 = vand.u32 4294901760, %v949_v28 }
  0xf7   : > { %2454 = vmatprep.subr.bf16.mxu0 %v2896_v0 }
  0xf8   : > { %v3386_v56 = vsub.f32 %v949_v28, %v993_v32 }
  0xfa   : > { %2456 = vmatpush3.bf16.msra.mxu0 %v3218_v34  ;;  %v996_v34 = vand.u32 4294901760, %v950_v29  ;;  %v3661_v46 = vand.u32 4294901760, %v3386_v56 }
  0xfb   : > { %2457 = vmatprep.subr.bf16.mxu0 %v2896_v0 }
  0xfc   : > { %v3388_v19 = vsub.f32 %v950_v29, %v996_v34  ;;  %v1127_v6 = vsub.f32 %v3386_v56, %v3661_v46 }
  0xfe   : > { %2459 = vmatpush3.bf16.msra.mxu0 %v3220_v35  ;;  %v3362_v35 = vpack.c.bf16 %v996_v34, %v993_v32  ;;  %v3662_v32 = vand.u32 4294901760, %v3383_v53  ;;  %v3660_v47 = vand.u32 4294901760, %v3388_v19  ;;  %v1128_v8 = vand.u32 4294901760, %v1127_v6 }
  0xff   : > { %2460 = vmatprep.subr.bf16.mxu0 %v2896_v0 }
 0x100   : > { %v1134_v7 = vsub.f32 %v3388_v19, %v3660_v47 }
 0x102   : > { %2462 = vmatpush3.bf16.msra.mxu0 %v3223_v36  ;;  %v951_v36 = vld [vmem:[#allocation7 + $0x60] sm:$0xff] }
 0x103   : > { %2463 = vmatprep.subr.bf16.mxu0 %v2896_v0 }
 0x106   : > { %2465 = vmatpush3.bf16.msra.mxu0 %v3225_v37  ;;  %v952_v37 = vld [vmem:[#allocation7 + $0x68] sm:$0xff] }
 0x107   : > { %2466 = vmatprep.subr.bf16.mxu0 %v2896_v0  ;;  %v1002_v11 = vand.u32 4294901760, %v952_v37 }
 0x109   : > { %v3392_v21 = vsub.f32 %v952_v37, %v1002_v11  ;;  %v1120_v37 = vsub.f32 %v3383_v53, %v3662_v32 }
 0x10a   : > { %2468 = vmatpush3.bf16.msra.mxu0 %v3227_v39  ;;  %v999_v39 = vand.u32 4294901760, %v951_v36 }
 0x10b   : > { %2469 = vmatprep.subr.bf16.mxu0 %v2896_v0 }
 0x10c   : > { %v3366_v30 = vpack.c.bf16 %v1002_v11, %v999_v39  ;;  %v3390_v20 = vsub.f32 %v951_v36, %v999_v39  ;;  %v1121_v11 = vand.u32 4294901760, %v1120_v37 }
 0x10d   : > { %2102 = vmatmul.mubr.f32.vlgmr.msra.gmra.mrb[0].mxu0 %v3140_v31 }
 0x10e   : > { %2471 = vmatpush3.bf16.msra.mxu0 %v3121_v12  ;;  %2136 = vmatprep.mubr.msk.f32.mxu0 %vm2897_vm0, %v2898_v1  ;;  %v941_v12 = vld [vmem:[#allocation7 + $0x10] sm:$0xff] }
 0x10f   : > { %2472 = vmatprep.subr.bf16.mxu0 %v2896_v0 }
 0x112   : > { %2474 = vmatpush3.bf16.msra.mxu0 %v3124_v13  ;;  %v942_v13 = vld [vmem:[#allocation7 + $0x18] sm:$0xff] }
 0x113   : > { %2475 = vmatprep.subr.bf16.mxu0 %v2896_v0 }
 0x116   : > { %2477 = vmatpush3.bf16.msra.mxu0 %v3128_v18  ;;  %v969_v18 = vand.u32 4294901760, %v941_v12 }
 0x117   : > { %2478 = vmatprep.subr.bf16.mxu0 %v2896_v0 }
 0x118   : > { %v3368_v40 = vsub.f32 %v941_v12, %v969_v18 }
 0x11a   : > { %2480 = vmatpush3.bf16.msra.mxu0 %v3137_v26  ;;  %v972_v26 = vand.u32 4294901760, %v942_v13  ;;  %v1070_v10 = vand.u32 4294901760, %v3368_v40 }
 0x11b   : > { %2481 = vmatprep.subr.bf16.mxu0 %v2896_v0 }
 0x11c   : > { %v3346_v45 = vpack.c.bf16 %v972_v26, %v969_v18  ;;  %v3370_v15 = vsub.f32 %v942_v13, %v972_v26  ;;  %v1071_v44 = vsub.f32 %v3368_v40, %v1070_v10  ;;  %v1091_v13 = vand.u32 4294901760, %v3374_v16 }
 0x11d   : > { %v3420_v18 = vpack.c.bf16 %v1065_v43, %v1058_v42  ;;  %v1135_v42 = vand.u32 4294901760, %v1134_v7  ;;  %v3659_v43 = vand.u32 4294901760, %v3390_v20 }
 0x11e   : > { %2483 = vmatpush3.bf16.msra.mxu0 %v3145_v38  ;;  %v943_v38 = vld [vmem:[#allocation7 + $0x20] sm:$0xff]  ;;  %2498 = vmatpush3.bf16.msra.mxu1 %v3346_v45  ;;  %v1077_v33 = vand.u32 4294901760, %v3370_v15  ;;  %v1072_v26 = vand.u32 4294901760, %v1071_v44  ;;  %v3658_v44 = vand.u32 4294901760, %v3392_v21 }
 0x11f   : > { %2484 = vmatprep.subr.bf16.mxu0 %v2896_v0  ;;  %v975_v52 = vand.u32 4294901760, %v943_v38  ;;  %2499 = vmatprep.subr.bf16.mxu1 %v2896_v0 }
 0x120   : > { %v1078_v50 = vsub.f32 %v3370_v15, %v1077_v33 }
 0x121   : > { %v3372_v41 = vsub.f32 %v943_v38, %v975_v52 }
 0x122   : > { %2486 = vmatpush3.bf16.msra.mxu0 %v3169_v55  ;;  %v3350_v55 = vpack.c.bf16 %v978_v54, %v975_v52  ;;  %v1079_v38 = vand.u32 4294901760, %v1078_v50  ;;  %v1092_v52 = vsub.f32 %v3374_v16, %v1091_v13  ;;  %v2533_v50 = vpack.c.bf16 %v1135_v42, %v1128_v8 }
 0x123   : > { %2487 = vmatprep.subr.bf16.mxu0 %v2896_v0  ;;  %v1084_v12 = vand.u32 4294901760, %v3372_v41  ;;  %v2548_v6 = vpack.c.bf16 %v3374_v16, %v3372_v41  ;;  %v2557_v42 = vpack.c.bf16 %v3388_v19, %v3386_v56  ;;  %v3677_v16 = vand.u32 4294901760, %v3388_v19 }
 0x124   : > { %2501 = vmatpush3.bf16.msra.mxu1 %v3350_v55  ;;  %v3428_v54 = vpack.c.bf16 %v1079_v38, %v1072_v26  ;;  %v1093_v59 = vand.u32 4294901760, %v1092_v52  ;;  %v1141_v26 = vsub.f32 %v3390_v20, %v3659_v43  ;;  %v1148_v38 = vsub.f32 %v3392_v21, %v3658_v44 }
 0x125   : > { %2502 = vmatprep.subr.bf16.mxu1 %v2896_v0  ;;  %v1085_v51 = vsub.f32 %v3372_v41, %v1084_v12  ;;  %v3676_v41 = vand.u32 4294901760, %v3386_v56 }
 0x126   : > { %2489 = vmatpush3.bf16.msra.mxu0 %v3181_v62  ;;  %v947_v62 = vld [vmem:[#allocation7 + $0x40] sm:$0xff]  ;;  %v1149_v52 = vand.u32 4294901760, %v1148_v38  ;;  %v2563_v38 = vpack.c.bf16 %v3400_v5, %v3398_v27 }
 0x127   : > { %2490 = vmatprep.subr.bf16.mxu0 %v2896_v0 }
 0x12a   : > { %2492 = vmatpush3.bf16.msra.mxu0 %v3185_v2  ;;  %v987_v2 = vand.u32 4294901760, %v947_v62 }
 0x12c   : > { %v3358_v4 = vpack.c.bf16 %v990_v3, %v987_v2  ;;  %v3381_v49 = vsub.f32 %v947_v62, %v987_v2 }
 0x12d   : > { %2137 = vmatmul.mubr.f32.vlgmr.msra.gmra.mrb[0].mxu0 %v3140_v31  ;;  %v981_v31 = vand.u32 4294901760, %v945_v58 }
 0x12e   : > { %v3663_v29 = vand.u32 4294901760, %v3381_v49  ;;  %v2554_v8 = vpack.c.bf16 %v3383_v53, %v3381_v49 }
 0x12f   : > { %v3354_v61 = vpack.c.bf16 %v984_v60, %v981_v31  ;;  %v3377_v48 = vsub.f32 %v945_v58, %v981_v31  ;;  %v1086_v58 = vand.u32 4294901760, %v1085_v51  ;;  %v1105_v60 = vand.u32 4294901760, %v3379_v17 }
 0x130   : > { %v1113_v36 = vsub.f32 %v3381_v49, %v3663_v29  ;;  %v1142_v51 = vand.u32 4294901760, %v1141_v26  ;;  %v2560_v26 = vpack.c.bf16 %v3392_v21, %v3390_v20 }
 0x131   : > { %2504 = vmatpush3.bf16.msra.mxu1 %v3354_v61  ;;  %v1098_v31 = vand.u32 4294901760, %v3377_v48  ;;  %v2524_v62 = vpack.c.bf16 %v1093_v59, %v1086_v58  ;;  %v1106_v2 = vsub.f32 %v3379_v17, %v1105_v60  ;;  %v3657_v58 = vand.u32 4294901760, %v3398_v27 }
 0x132   : > { %2505 = vmatprep.subr.bf16.mxu1 %v2896_v0  ;;  %v1114_v39 = vand.u32 4294901760, %v1113_v36  ;;  %v3656_v59 = vand.u32 4294901760, %v3400_v5  ;;  %v2551_v7 = vpack.c.bf16 %v3379_v17, %v3377_v48  ;;  %v3679_v17 = vand.u32 4294901760, %v3392_v21 }
 0x133   : > { %v1099_v63 = vsub.f32 %v3377_v48, %v1098_v31  ;;  %v1107_v28 = vand.u32 4294901760, %v1106_v2  ;;  %v1155_v2 = vsub.f32 %v3398_v27, %v3657_v58  ;;  %v3678_v48 = vand.u32 4294901760, %v3390_v20 }
 0x134   : > { %v2530_v57 = vpack.c.bf16 %v1121_v11, %v1114_v39  ;;  %v2542_v39 = vpack.c.bf16 %v3265_v25, %v3263_v24  ;;  %v2545_v11 = vpack.c.bf16 %v3370_v15, %v3368_v40  ;;  %v2596_v24 = vpack.c.bf16 %v1091_v13, %v1084_v12 }
 0x135   : > { %2507 = vmatpush3.bf16.msra.mxu1 %v3358_v4  ;;  %v1100_v3 = vand.u32 4294901760, %v1099_v63  ;;  %v2536_v63 = vpack.c.bf16 %v1149_v52, %v1142_v51  ;;  %v1719_v51 = vld [vmem:[%s3649_s2] ss:$0 sm:$0xff]  ;;  %v2599_v25 = vpack.c.bf16 %v1105_v60, %v1098_v31  ;;  %v3674_v40 = vand.u32 4294901760, %v3381_v49 }
 0x136   : > { %2508 = vmatprep.subr.bf16.mxu1 %v2896_v0  ;;  %v3675_v15 = vand.u32 4294901760, %v3383_v53  ;;  %v3680_v49 = vand.u32 4294901760, %v3398_v27  ;;  %v3681_v53 = vand.u32 4294901760, %v3400_v5 }
 0x137   : > { %v2527_v34 = vpack.c.bf16 %v1107_v28, %v1100_v3  ;;  %v1162_v3 = vsub.f32 %v3400_v5, %v3656_v59  ;;  %v1156_v28 = vand.u32 4294901760, %v1155_v2 }
 0x139   : > { %2510 = vmatpush3.bf16.msra.mxu1 %v3362_v35  ;;  %v1163_v36 = vand.u32 4294901760, %v1162_v3 }
 0x13a   : > { %2511 = vmatprep.subr.bf16.mxu1 %v2896_v0 }
 0x13b   : > { %v2539_v37 = vpack.c.bf16 %v1163_v36, %v1156_v28 }
 0x13d   : > { %2513 = vmatpush3.bf16.msra.mxu1 %v3366_v30 }
 0x13e   : > { %2514 = vmatprep.subr.bf16.mxu1 %v2896_v0 }
 0x141   : > { %2516 = vmatpush3.bf16.msra.mxu1 %v3396_v23 }
 0x142   : > { %2517 = vmatprep.subr.bf16.mxu1 %v2896_v0 }
 0x200   : > { %v930_v52 = vpop.f32.mrb[0].mxu0 }
 0x201   : > { %v2637_v2 = vadd.f32 %v1719_v51, %v930_v52  ;;  %v2138_v3 = vpop.f32.mrb[1].mxu0 }
 0x203   : > { %v935_v28 = vmul.f32 0.70710677, %v2637_v2  ;;  %v934_v59 = vmul.f32 0.5, %v2637_v2 }
 0x205   : > { %2731 = verf.f32 %v935_v28 }
 0x20f   : > { %v2732_v36 = vpop.eup %2731 }
 0x210   : > { %v937_v58 = vadd.f32 1.0, %v2732_v36 }
 0x212   : > { %v938_v44 = vmul.f32 %v937_v58, %v934_v59 }
 0x214   : > { %v3489_v43 = vand.u32 4294901760, %v938_v44 }
 0x216   : > { %v1044_v47 = vsub.f32 %v938_v44, %v3489_v43 }
 0x218   : > { %v1045_v46 = vand.u32 4294901760, %v1044_v47 }
 0x21a   : > { %v1046_v32 = vsub.f32 %v1044_v47, %v1045_v46 }
 0x21c   : > { %v1047_v29 = vand.u32 4294901760, %v1046_v32 }
 0x21e   : > { %2172 = vmatmul.mubr.f32.vlgmr.msra.gmra.mrb[0].mxu1 %v1047_v29 }
 0x21f   : > { %2519 = vmatpush3.bf16.msra.mxu1 %v3420_v18  ;;  %2206 = vmatprep.mubr.msk.f32.mxu1 %vm2897_vm0, %v2898_v1  ;;  %v2590_v18 = vpack.c.bf16 %v1063_v14, %v1056_v22  ;;  %v2602_v22 = vpack.c.bf16 %v3675_v15, %v3674_v40  ;;  %v2605_v14 = vpack.c.bf16 %v3677_v16, %v3676_v41 }
 0x220   : > { %2520 = vmatprep.subr.bf16.mxu1 %v2896_v0 }
 0x223   : > { %2522 = vmatpush3.bf16.msra.mxu1 %v3428_v54  ;;  %v2593_v54 = vpack.c.bf16 %v1077_v33, %v1070_v10  ;;  %v2608_v10 = vpack.c.bf16 %v3679_v17, %v3678_v48  ;;  %v2611_v33 = vpack.c.bf16 %v3681_v53, %v3680_v49 }
 0x224   : > { %2523 = vmatprep.subr.bf16.mxu1 %v2896_v0 }
 0x227   : > { %2525 = vmatpush3.bf16.msra.mxu1 %v2524_v62 }
 0x228   : > { %2526 = vmatprep.subr.bf16.mxu1 %v2896_v0 }
 0x22b   : > { %2528 = vmatpush3.bf16.msra.mxu1 %v2527_v34 }
 0x22c   : > { %2529 = vmatprep.subr.bf16.mxu1 %v2896_v0 }
 0x22f   : > { %2531 = vmatpush3.bf16.msra.mxu1 %v2530_v57 }
 0x230   : > { %2532 = vmatprep.subr.bf16.mxu1 %v2896_v0 }
 0x233   : > { %2534 = vmatpush3.bf16.msra.mxu1 %v2533_v50 }
 0x234   : > { %2535 = vmatprep.subr.bf16.mxu1 %v2896_v0 }
 0x237   : > { %2537 = vmatpush3.bf16.msra.mxu1 %v2536_v63 }
 0x238   : > { %2538 = vmatprep.subr.bf16.mxu1 %v2896_v0 }
 0x23b   : > { %2540 = vmatpush3.bf16.msra.mxu1 %v2539_v37 }
 0x23c   : > { %2541 = vmatprep.subr.bf16.mxu1 %v2896_v0 }
 0x23e   : > { %2207 = vmatmul.mubr.f32.vlgmr.msra.gmra.mrb[0].mxu1 %v3489_v43 }
 0x23f   : > { %2543 = vmatpush3.bf16.msra.mxu1 %v2542_v39  ;;  %2241 = vmatprep.mubr.msk.f32.mxu1 %vm2897_vm0, %v2898_v1 }
 0x240   : > { %2544 = vmatprep.subr.bf16.mxu1 %v2896_v0 }
 0x243   : > { %2546 = vmatpush3.bf16.msra.mxu1 %v2545_v11 }
 0x244   : > { %2547 = vmatprep.subr.bf16.mxu1 %v2896_v0 }
 0x247   : > { %2549 = vmatpush3.bf16.msra.mxu1 %v2548_v6 }
 0x248   : > { %2550 = vmatprep.subr.bf16.mxu1 %v2896_v0 }
 0x24b   : > { %2552 = vmatpush3.bf16.msra.mxu1 %v2551_v7 }
 0x24c   : > { %2553 = vmatprep.subr.bf16.mxu1 %v2896_v0 }
 0x24f   : > { %2555 = vmatpush3.bf16.msra.mxu1 %v2554_v8 }
 0x250   : > { %2556 = vmatprep.subr.bf16.mxu1 %v2896_v0 }
 0x253   : > { %2558 = vmatpush3.bf16.msra.mxu1 %v2557_v42 }
 0x254   : > { %2559 = vmatprep.subr.bf16.mxu1 %v2896_v0 }
 0x257   : > { %2561 = vmatpush3.bf16.msra.mxu1 %v2560_v26 }
 0x258   : > { %2562 = vmatprep.subr.bf16.mxu1 %v2896_v0 }
 0x25b   : > { %2564 = vmatpush3.bf16.msra.mxu1 %v2563_v38 }
 0x25c   : > { %2565 = vmatprep.subr.bf16.mxu1 %v2896_v0 }
 0x25e   : > { %2242 = vmatmul.mubr.f32.vlgmr.msra.gmra.mrb[0].mxu1 %v1044_v47 }
 0x25f   : > { %2567 = vmatpush3.bf16.msra.mxu1 %v3261_v9  ;;  %2276 = vmatprep.mubr.msk.f32.mxu1 %vm2897_vm0, %v2898_v1 }
 0x260   : > { %2568 = vmatprep.subr.bf16.mxu1 %v2896_v0 }
 0x263   : > { %2570 = vmatpush3.bf16.msra.mxu1 %v3346_v45 }
 0x264   : > { %2571 = vmatprep.subr.bf16.mxu1 %v2896_v0 }
 0x267   : > { %2573 = vmatpush3.bf16.msra.mxu1 %v3350_v55 }
 0x268   : > { %2574 = vmatprep.subr.bf16.mxu1 %v2896_v0 }
 0x26b   : > { %2576 = vmatpush3.bf16.msra.mxu1 %v3354_v61 }
 0x26c   : > { %2577 = vmatprep.subr.bf16.mxu1 %v2896_v0 }
 0x26f   : > { %2579 = vmatpush3.bf16.msra.mxu1 %v3358_v4 }
 0x270   : > { %2580 = vmatprep.subr.bf16.mxu1 %v2896_v0 }
 0x273   : > { %2582 = vmatpush3.bf16.msra.mxu1 %v3362_v35 }
 0x274   : > { %2583 = vmatprep.subr.bf16.mxu1 %v2896_v0 }
 0x277   : > { %2585 = vmatpush3.bf16.msra.mxu1 %v3366_v30 }
 0x278   : > { %2586 = vmatprep.subr.bf16.mxu1 %v2896_v0 }
 0x27b   : > { %2588 = vmatpush3.bf16.msra.mxu1 %v3396_v23 }
 0x27c   : > { %2589 = vmatprep.subr.bf16.mxu1 %v2896_v0 }
 0x27e   : > { %2277 = vmatmul.mubr.f32.vlgmr.msra.gmra.mrb[0].mxu1 %v1045_v46 }
 0x27f   : > { %2591 = vmatpush3.bf16.msra.mxu1 %v2590_v18  ;;  %2311 = vmatprep.mubr.msk.f32.mxu1 %vm2897_vm0, %v2898_v1 }
 0x280   : > { %2592 = vmatprep.subr.bf16.mxu1 %v2896_v0 }
 0x283   : > { %2594 = vmatpush3.bf16.msra.mxu1 %v2593_v54 }
 0x284   : > { %2595 = vmatprep.subr.bf16.mxu1 %v2896_v0 }
 0x287   : > { %2597 = vmatpush3.bf16.msra.mxu1 %v2596_v24 }
 0x288   : > { %2598 = vmatprep.subr.bf16.mxu1 %v2896_v0 }
 0x28b   : > { %2600 = vmatpush3.bf16.msra.mxu1 %v2599_v25 }
 0x28c   : > { %2601 = vmatprep.subr.bf16.mxu1 %v2896_v0 }
 0x28f   : > { %2603 = vmatpush3.bf16.msra.mxu1 %v2602_v22 }
 0x290   : > { %2604 = vmatprep.subr.bf16.mxu1 %v2896_v0 }
 0x293   : > { %2606 = vmatpush3.bf16.msra.mxu1 %v2605_v14 }
 0x294   : > { %2607 = vmatprep.subr.bf16.mxu1 %v2896_v0 }
 0x297   : > { %2609 = vmatpush3.bf16.msra.mxu1 %v2608_v10 }
 0x298   : > { %2610 = vmatprep.subr.bf16.mxu1 %v2896_v0 }
 0x29b   : > { %2612 = vmatpush3.bf16.msra.mxu1 %v2611_v33 }
 0x29c   : > { %2613 = vmatprep.subr.bf16.mxu1 %v2896_v0 }
 0x29e   : > { %2312 = vmatmul.mubr.f32.vlgmr.msra.gmra.mrb[0].mxu1 %v3489_v43 }
 0x29f   : > { %2615 = vmatpush3.bf16.msra.mxu1 %v3261_v9  ;;  %2346 = vmatprep.mubr.msk.f32.mxu1 %vm2897_vm0, %v2898_v1  ;;  %v1720_v1 = vld [vmem:[%s3651_s4] ss:$0 sm:$0xff] }
 0x2a0   : > { %2616 = vmatprep.subr.bf16.mxu1 %v2896_v0 }
 0x2a3   : > { %2618 = vmatpush3.bf16.msra.mxu1 %v3346_v45 }
 0x2a4   : > { %2619 = vmatprep.subr.bf16.mxu1 %v2896_v0 }
 0x2a7   : > { %2621 = vmatpush3.bf16.msra.mxu1 %v3350_v55 }
 0x2a8   : > { %2622 = vmatprep.subr.bf16.mxu1 %v2896_v0 }
 0x2ab   : > { %2624 = vmatpush3.bf16.msra.mxu1 %v3354_v61 }
 0x2ac   : > { %2625 = vmatprep.subr.bf16.mxu1 %v2896_v0 }
 0x2af   : > { %2627 = vmatpush3.bf16.msra.mxu1 %v3358_v4 }
 0x2b0   : > { %2628 = vmatprep.subr.bf16.mxu1 %v2896_v0 }
 0x2b3   : > { %2630 = vmatpush3.bf16.msra.mxu1 %v3362_v35 }
 0x2b4   : > { %2631 = vmatprep.subr.bf16.mxu1 %v2896_v0 }
 0x2b7   : > { %2633 = vmatpush3.bf16.msra.mxu1 %v3366_v30 }
 0x2b8   : > { %2634 = vmatprep.subr.bf16.mxu1 %v2896_v0 }
 0x2bb   : > { %2636 = vmatpush3.bf16.msra.mxu1 %v3396_v23 }
 0x2be   : > { %2347 = vmatmul.mubr.f32.vlgmr.msra.gmra.mrb[0].mxu1 %v3489_v43 }
 0x391   : > { %v1599_v9 = vpop.f32.mrb[0].mxu1 }
 0x392   : > { %v2638_v45 = vadd.f32 %v1720_v1, %v1599_v9  ;;  %v2348_v55 = vpop.f32.mrb[1].mxu1 }
 0x394   : > { %1603 = vst [vmem:[%s268_s28] sm:$0xff] %v2638_v45 }
 0x395   : > { %2832 = shalt.err (!%p2829_p2)
}
 0x396   : > { %s2833_s12 = scalar_lea.hbm %s3603_s15, 128  ;;  %s2837_s26 = scalar_lea.hbm %s3652_s5, 256 }
 0x397   : > { %p2834_p13 = scmp.ne.s32.totalorder %s3603_s15, %s2833_s12  ;;  %p2838_p4 = scmp.lt.u32.totalorder %s3603_s15, %s3652_s5 }
 0x398   : > { %p2839_p5 = scmp.lt.u32.totalorder %s2837_s26, %s2833_s12  ;;  %p2841_p11 = scmp.lt.u32.totalorder %s2833_s12, %s3603_s15 }
 0x399   : > { %p2835_p6 = pnand %p2834_p13, %p3682_p0 }
 0x39a   : > { %p2840_p8 = por %p2839_p5, %p2838_p4 }
 0x39b   : > { %p2836_p10 = pneg %p2835_p6 }
 0x39c   : > { %p2842_p1 = por %p2841_p11, %p2840_p8 }
 0x39e   : > { %p2843_p3 = pnand %p2842_p1, %p2836_p10 }
 0x3a0   : > { %2846 = shalt.err (!%p2843_p3)
}
 0x3a1   : > { %2669 = dma.vmem_to_hbm [thread:$0]  (%p3682_p0), %s3605_s7, 128, %s3603_s15, %s1605_s16  }
 0x3a2 PF: > { %s1630_s11 = sand.u32 1, %s2877_s18   ;;  %p3683_p7 = scmp.ne.s32.totalorder %s3665_s25, 0 }
 0x3a3   : > { %p3684_p9 = scmp.ge.s32.totalorder %s2889_s21, 2  ;;  %s1631_s28 = scalar_lea.sflag [#allocation4], %s1630_s11 }
 0x3a5   : > { %p2683_p12 = pnand %p3684_p9, %p3683_p7 }
 0x3a7   : > { %2872 = dma.done.wait (!%p2683_p12), %s1631_s28, 128  }
 0x3a8   : > { %2874 = vsyncadd (!%p2683_p12), %s1631_s28, 4294967168  ;;  %p19_p2 = scmp.ge.s32.totalorder %s3040_s14, 4   ;;  %s3685_s18 = smov %s2881_s19 }
 0x3a9   : > { %s3686_s19 = smov %s2885_s20  ;;  %s3687_s20 = smov %s3056_s27 }
 0x3aa   : > { %s3688_s21 = smov %s3040_s14  ;;  %21 = sbr.rel (!%p19_p2) target bundleno = 6 (0x6), region = 93 }
 0x3b1   :  { %1636 = vsyncpa [#allocation3], 1 }
 0x3b2   :  { %1638 = vsyncpa [#allocation3 + $0x1], 1 }
 0x3b3   :  { %1639 = vsyncpa [#allocation6], 1 }
 0x3b4   :  { %1640 = vsyncpa [#allocation4], 1 }
 0x3b5   :  { %1642 = vsyncpa [#allocation4 + $0x1], 1 }

</bundles_post_ra>
